<compile_context>
chip_gen: v7x
topology: tpu7x:2x2x1
jax: 0.10.0
libtpu: 0.0.40
codegen_flags: <defaults>
</compile_context>

<pallas_src>
import jax
import jax.numpy as jnp
import numpy as np
from jax.experimental import pallas as pl
from jax.experimental.pallas import tpu as pltpu


def _masked_ce_kernel(logits_ref, target_ref, wm_ref, out_ref):
    # logits_ref: (TB, Cp) native dtype   target_ref: (TB, 1) int32
    # wm_ref:     (TB, 1) f32             out_ref:    (1, 8, 128) f32
    logits = logits_ref[...].astype(jnp.float32)                       # (TB, Cp)
    t = target_ref[...]                                                # (TB, 1)
    wm = wm_ref[...]                                                   # (TB, 1)

    # Numerically-stable logsumexp (padded lanes hold -1e30 -> exp underflows to 0).
    mx = jnp.max(logits, axis=-1, keepdims=True)                       # (TB, 1)
    shifted = logits - mx                                              # (TB, Cp)
    lse = jnp.log(jnp.sum(jnp.exp(shifted), axis=-1, keepdims=True))   # (TB, 1)

    # Gather the target logit without materializing an f32 one-hot.
    col = jax.lax.broadcasted_iota(jnp.int32, shifted.shape, 1)        # (TB, Cp)
    picked = jnp.sum(jnp.where(col == t, shifted, 0.0),
                     axis=-1, keepdims=True)                           # (TB, 1)

    nll = lse - picked                                                 # (TB, 1)
    num = jnp.sum(wm * nll)                                            # scalar
    den = jnp.sum(wm)                                                  # scalar

    # Lane-dense partial output: lane 0 = num, lane 1 = den (rest zero).
    lane = jax.lax.broadcasted_iota(jnp.int32, out_ref.shape, 2)       # (1, 8, 128)
    out_ref[...] = (jnp.where(lane == 0, num, 0.0)
                    + jnp.where(lane == 1, den, 0.0))


def masked_cross_entropy_loss(logits, target, mask, weight, *, block_b=256):
    """logits (B, C) float (any dtype), target (B,) int, mask (B,) bool,
    weight (C,) float.  Returns the scalar mean masked weighted CE loss."""
    B, C = logits.shape

    # NOTE: the PyTorch module raises ValueError when the mask is all zeros.
    # That host-side check forces a device sync, so it is intentionally
    # dropped here; an all-zero mask (or all-zero surviving weights) yields
    # NaN (0/0) instead.
    # TODO(synk): optionally wire a jax.experimental.checkify assert for the
    # all-zero-mask case.

    target = target.astype(jnp.int32)
    # Precompute wm = weight[target] * mask (cheap XLA gather) so the kernel
    # never touches the (C,) weight vector or the raw mask.
    wm = weight.astype(jnp.float32)[target] * mask.astype(jnp.float32)

    # ---- Pad C to a lane multiple of 128 (large-negative so max/exp ignore it).
    Cp = ((C + 127) // 128) * 128
    if Cp != C:
        logits = jnp.pad(logits, ((0, 0), (0, Cp - C)), constant_values=-1e30)

    # ---- Row tile.  Must be a multiple of 8 (sublanes); sized so
    # 2 buffers x TB x Cp x itemsize stays comfortably inside scoped VMEM on
    # every generation (v7x has only 64 MiB physical VMEM).
    # TODO(synk): for very large vocab (C >= 64K) add a second grid axis over
    # C with an online (flash-style) logsumexp instead of padding C in one block.
    TB = min(block_b, max(8, ((B + 7) // 8) * 8))
    Bp = ((B + TB - 1) // TB) * TB
    if Bp != B:
        logits = jnp.pad(logits, ((0, Bp - B), (0, 0)))      # zero rows
        target = jnp.pad(target, (0, Bp - B))                # class 0
        wm = jnp.pad(wm, (0, Bp - B))                        # weight 0 -> no effect

    G = Bp // TB

    partials = pl.pallas_call(
        _masked_ce_kernel,
        out_shape=jax.ShapeDtypeStruct((G, 8, 128), jnp.float32),
        grid=(G,),
        in_specs=[
            # logits keep their native dtype (bf16 halves HBM bytes).
            pl.BlockSpec((TB, Cp), lambda i: (i, 0)),
            pl.BlockSpec((TB, 1), lambda i: (i, 0)),
            pl.BlockSpec((TB, 1), lambda i: (i, 0)),
        ],
        out_specs=pl.BlockSpec((1, 8, 128), lambda i: (i, 0, 0)),
        compiler_params=pltpu.CompilerParams(
            dimension_semantics=("parallel",),
        ),
    )(logits, target.reshape(Bp, 1), wm.reshape(Bp, 1))

    num = jnp.sum(partials[:, 0, 0])
    den = jnp.sum(partials[:, 0, 1])
    return num / den


def _reference(logits, target, mask, weight):
    # Pure-JAX reference mirroring F.cross_entropy(weight=..., reduction='mean')
    # after masked_select of rows.
    logits = logits.astype(jnp.float32)
    m = mask.astype(jnp.float32)
    lse = jax.nn.logsumexp(logits, axis=-1)
    picked = jnp.take_along_axis(
        logits, target[:, None].astype(jnp.int32), axis=-1)[:, 0]
    nll = lse - picked
    w = weight.astype(jnp.float32)[target]
    wm = w * m
    return jnp.sum(wm * nll) / jnp.sum(wm)


if __name__ == "__main__":
    key = jax.random.PRNGKey(0)

    # ---- Case 1: small, single tile, f32 ------------------------------------
    k1, k2, k3, k4 = jax.random.split(key, 4)
    B, C = 8, 16
    logits = jax.random.normal(k1, (B, C), dtype=jnp.float32)
    target = jax.random.randint(k2, (B,), 0, C, dtype=jnp.int32)
    mask = jax.random.bernoulli(k3, p=0.6, shape=(B,))
    mask = mask.at[0].set(True)  # keep the demo mask non-empty
    weight = jax.random.uniform(k4, (C,), dtype=jnp.float32, minval=0.5, maxval=1.5)

    loss = masked_cross_entropy_loss(logits, target, mask, weight)
    jax.block_until_ready(loss)
    np.testing.assert_allclose(
        np.asarray(loss), np.asarray(_reference(logits, target, mask, weight)),
        rtol=1e-5, atol=1e-5)

    # ---- Case 2: ragged B and C (exercises B/C padding + multi-tile grid) ---
    k5, k6, k7, k8 = jax.random.split(jax.random.PRNGKey(1), 4)
    B2, C2 = 37, 45
    logits2 = jax.random.normal(k5, (B2, C2), dtype=jnp.float32)
    target2 = jax.random.randint(k6, (B2,), 0, C2, dtype=jnp.int32)
    mask2 = jax.random.bernoulli(k7, p=0.5, shape=(B2,))
    mask2 = mask2.at[3].set(True)
    weight2 = jax.random.uniform(k8, (C2,), dtype=jnp.float32, minval=0.5, maxval=1.5)

    loss2 = masked_cross_entropy_loss(logits2, target2, mask2, weight2, block_b=16)
    jax.block_until_ready(loss2)
    np.testing.assert_allclose(
        np.asarray(loss2), np.asarray(_reference(logits2, target2, mask2, weight2)),
        rtol=1e-5, atol=1e-5)

    # ---- Case 3: bf16 logits shipped natively over the DMA ------------------
    logits_bf16 = logits2.astype(jnp.bfloat16)
    loss3 = masked_cross_entropy_loss(logits_bf16, target2, mask2, weight2, block_b=16)
    jax.block_until_ready(loss3)
    np.testing.assert_allclose(
        np.asarray(loss3), np.asarray(_reference(logits_bf16, target2, mask2, weight2)),
        rtol=2e-2, atol=2e-2)

    print("KERNEL_OK")
</pallas_src>

<mosaic_0001>
module attributes {stable_mosaic.version = 11 : i64} {
  func.func @_masked_ce_kernel(%arg0: i32, %arg1: memref<8x128xf32, #tpu.memory_space<vmem>>, %arg2: memref<8x1xi32, #tpu.memory_space<vmem>>, %arg3: memref<8x1xf32, #tpu.memory_space<vmem>>, %arg4: memref<1x8x128xf32, #tpu.memory_space<vmem>>) attributes {dimension_semantics = [#tpu.dimension_semantics<parallel>], iteration_bounds = array<i64: 1>, scalar_prefetch = 0 : i64, scratch_operands = 0 : i64, tpu.core_type = #tpu.core_type<tc>, window_params = [{transform_indices = @transform_0, window_bounds = array<i64: 8, 128>}, {transform_indices = @transform_1, window_bounds = array<i64: 8, 1>}, {transform_indices = @transform_2, window_bounds = array<i64: 8, 1>}, {transform_indices = @transform_3, window_bounds = array<i64: 1, 8, 128>}]} {
    %c0 = arith.constant 0 : index
    %c0_0 = arith.constant 0 : index
    %0 = vector.load %arg1[%c0, %c0_0] : memref<8x128xf32, #tpu.memory_space<vmem>>, vector<8x128xf32>
    %c0_1 = arith.constant 0 : index
    %c0_2 = arith.constant 0 : index
    %1 = vector.load %arg2[%c0_1, %c0_2] : memref<8x1xi32, #tpu.memory_space<vmem>>, vector<8x1xi32>
    %c0_3 = arith.constant 0 : index
    %c0_4 = arith.constant 0 : index
    %2 = vector.load %arg3[%c0_3, %c0_4] : memref<8x1xf32, #tpu.memory_space<vmem>>, vector<8x1xf32>
    %cst = arith.constant dense<0xFF800000> : vector<8xf32>
    %3 = vector.multi_reduction <maximumf>, %0, %cst [1] : vector<8x128xf32> to vector<8xf32>
    %4 = vector.shape_cast %3 : vector<8xf32> to vector<8x1xf32>
    %5 = vector.broadcast %4 : vector<8x1xf32> to vector<8x128xf32>
    %6 = arith.subf %0, %5 : vector<8x128xf32>
    %7 = math.exp %6 : vector<8x128xf32>
    %cst_5 = arith.constant dense<0.000000e+00> : vector<8xf32>
    %8 = vector.multi_reduction <add>, %7, %cst_5 [1] : vector<8x128xf32> to vector<8xf32>
    %9 = vector.shape_cast %8 : vector<8xf32> to vector<8x1xf32>
    %10 = math.log %9 : vector<8x1xf32>
    %11 = tpu.iota {dimensions = array<i32: 1>} : vector<8x128xi32>
    %12 = vector.broadcast %1 : vector<8x1xi32> to vector<8x128xi32>
    %13 = arith.cmpi eq, %11, %12 : vector<8x128xi32>
    %cst_6 = arith.constant 0.000000e+00 : f32
    %14 = vector.broadcast %cst_6 : f32 to vector<8x128xf32>
    %15 = arith.select %13, %6, %14 : vector<8x128xi1>, vector<8x128xf32>
    %cst_7 = arith.constant dense<0.000000e+00> : vector<8xf32>
    %16 = vector.multi_reduction <add>, %15, %cst_7 [1] : vector<8x128xf32> to vector<8xf32>
    %17 = vector.shape_cast %16 : vector<8xf32> to vector<8x1xf32>
    %18 = arith.subf %10, %17 : vector<8x1xf32>
    %19 = arith.mulf %2, %18 : vector<8x1xf32>
    %20 = vector.shape_cast %19 : vector<8x1xf32> to vector<1x8x1xf32>
    %cst_8 = arith.constant dense<0.000000e+00> : vector<1xf32>
    %21 = vector.multi_reduction <add>, %20, %cst_8 [1, 2] : vector<1x8x1xf32> to vector<1xf32>
    %22 = vector.shape_cast %21 : vector<1xf32> to vector<1x1x1xf32>
    %23 = vector.extract %22[0, 0, 0] : f32 from vector<1x1x1xf32>
    %24 = vector.shape_cast %2 : vector<8x1xf32> to vector<1x8x1xf32>
    %cst_9 = arith.constant dense<0.000000e+00> : vector<1xf32>
    %25 = vector.multi_reduction <add>, %24, %cst_9 [1, 2] : vector<1x8x1xf32> to vector<1xf32>
    %26 = vector.shape_cast %25 : vector<1xf32> to vector<1x1x1xf32>
    %27 = vector.extract %26[0, 0, 0] : f32 from vector<1x1x1xf32>
    %28 = tpu.iota {dimensions = array<i32: 2>} : vector<1x8x128xi32>
    %c0_i32 = arith.constant 0 : i32
    %29 = vector.broadcast %c0_i32 : i32 to vector<1x8x128xi32>
    %30 = arith.cmpi eq, %28, %29 : vector<1x8x128xi32>
    %cst_10 = arith.constant 0.000000e+00 : f32
    %31 = vector.broadcast %23 : f32 to vector<1x8x128xf32>
    %32 = vector.broadcast %cst_10 : f32 to vector<1x8x128xf32>
    %33 = arith.select %30, %31, %32 : vector<1x8x128xi1>, vector<1x8x128xf32>
    %c1_i32 = arith.constant 1 : i32
    %34 = vector.broadcast %c1_i32 : i32 to vector<1x8x128xi32>
    %35 = arith.cmpi eq, %28, %34 : vector<1x8x128xi32>
    %cst_11 = arith.constant 0.000000e+00 : f32
    %36 = vector.broadcast %27 : f32 to vector<1x8x128xf32>
    %37 = vector.broadcast %cst_11 : f32 to vector<1x8x128xf32>
    %38 = arith.select %35, %36, %37 : vector<1x8x128xi1>, vector<1x8x128xf32>
    %39 = arith.addf %33, %38 : vector<1x8x128xf32>
    %c0_12 = arith.constant 0 : index
    %c0_13 = arith.constant 0 : index
    %c0_14 = arith.constant 0 : index
    %40 = vector.load %arg4[%c0_12, %c0_13, %c0_14] : memref<1x8x128xf32, #tpu.memory_space<vmem>>, vector<1x8x128xf32>
    tpu.vector_store %arg4[%c0_12, %c0_13, %c0_14], %39 {strides = array<i32>} : memref<1x8x128xf32, #tpu.memory_space<vmem>>, vector<1x8x128xf32>,
    return
  }
  func.func @transform_0(%arg0: i32) -> (i32, i32) {
    %c0_i32 = arith.constant 0 : i32
    %c0_i32_0 = arith.constant 0 : i32
    return %arg0, %c0_i32 : i32, i32
  }
  func.func @transform_1(%arg0: i32) -> (i32, i32) {
    %c0_i32 = arith.constant 0 : i32
    %c0_i32_0 = arith.constant 0 : i32
    return %arg0, %c0_i32 : i32, i32
  }
  func.func @transform_2(%arg0: i32) -> (i32, i32) {
    %c0_i32 = arith.constant 0 : i32
    %c0_i32_0 = arith.constant 0 : i32
    return %arg0, %c0_i32 : i32, i32
  }
  func.func @transform_3(%arg0: i32) -> (i32, i32, i32) {
    %c0_i32 = arith.constant 0 : i32
    %c0_i32_0 = arith.constant 0 : i32
    %c0_i32_1 = arith.constant 0 : i32
    return %arg0, %c0_i32, %c0_i32_0 : i32, i32, i32
  }
}

</mosaic_0001>

<bundles_post_ra>
// kernel: tpu_custom_call.1
= control target key start
LH: loop header
LB: loop body
LE: loop exit
PB: predicated region body
PF: predicated region fallthrough
CT: control target
= control target key end

     0   :  { %s159_s0 = inlined_call_operand.vmem [shape: f32[8,128], index: 0, kind: input, shape index: {}]   ;;  %s160_s1 = inlined_call_operand.vmem [shape: s32[8,1], index: 1, kind: input, shape index: {}]   ;;  %s161_s2 = inlined_call_operand.vmem [shape: f32[8,1], index: 2, kind: input, shape index: {}]   ;;  %s162_s3 = inlined_call_operand.hbm [shape: f32[1,8,128], index: 3, kind: output, shape index: {}]  }
   0x1   :  { %v15_v0 = vld [vmem:[%s159_s0] sm:$0xff] }
   0x2   :  { %8 = vsyncpa [#allocation3], 0  ;;  %18 = vmax.xlane.f32.xlu0 %v15_v0  ;;  %v116_v1 = vmov 0   ;;  %v16_v2 = vld [vmem:[%s160_s1] sm:$0xff]  ;;  %v27_v6 = vlaneseq  ;;  %vm38_vm1 = vcmask 7168   ;;  %s117_s17 = smov [#allocation2]  }
   0x3   :  { %87 = vset.pattern.permute.xlu0 %v116_v1  ;;  %v17_v15 = vld [vmem:[%s161_s2] sm:$0xff]  ;;  %s73_s18 = sshll.u32 %s117_s17, 4  ;;  %s74_s18 = int_to_ptr.vmem [resolvable:$true] %s73_s18 }
   0x4   :  { %v28_v7 = vand.u32 127, %v27_v6  ;;  %v49_v19 = vsel %vm38_vm1, %v17_v15, 0.0  ;;  %s92_s19 = scalar_lea.vmem %s74_s18, 128  ;;  %p97_p1 = scmp.lt.s32.totalorder %s74_s18, %s74_s18 }
   0x5   :  { %p93_p0 = scmp.ne.s32.totalorder %s74_s18, %s92_s19  ;;  %p98_p2 = scmp.lt.s32.totalorder %s92_s19, %s92_s19 }
   0x6   :  { %vm59_vm2 = vcmp.eq.s32.totalorder %v28_v7, 0  ;;  %vm62_vm3 = vcmp.eq.s32.totalorder %v28_v7, 1 }
   0x7   :  { %p99_p3 = por %p98_p2, %p97_p1 }
   0x9   :  { %p100_p4 = pnand %p99_p3, %p93_p0 }
  0x18   :  { %30 = vperm.xlu0 %87, %v16_v2  }
  0x8f   :  { %v19_v3 = vpop.xlane.xlu0 %18 }
  0x90   :  { %v20_v4 = vsub.f32 %v15_v0, %v19_v3 }
  0x92   :  { %v21_v5 = vmul.f32 1.442695, %v20_v4 }
  0x94   :  { %88 = vpow2.f32 %v21_v5 }
  0x97   :  { %v31_v8 = vpop.permute.xlu0 %30 }
  0x98   :  { %vm32_vm0 = vcmp.eq.s32.totalorder %v28_v7, %v31_v8 }
  0x99   :  { %v33_v10 = vsel %vm32_vm0, %v20_v4, 0.0 }
  0x9e   :  { %v89_v9 = vpop.eup %88 }
  0x9f   :  { %23 = vadd.xlane.f32.xlu1 %v89_v9 }
  0xa3   :  { %34 = vadd.xlane.f32.xlu1 %v33_v10 }
 0x12c   :  { %v24_v11 = vpop.xlane.xlu1 %23 }
 0x12d   :  { %90 = vlog2.f32 %v24_v11 }
 0x130   :  { %v35_v14 = vpop.xlane.xlu1 %34 }
 0x137   :  { %v91_v12 = vpop.eup %90 }
 0x138   :  { %v26_v13 = vmul.f32 0.6931472, %v91_v12 }
 0x13a   :  { %v36_v16 = vsub.f32 %v26_v13, %v35_v14 }
 0x13c   :  { %v37_v17 = vmul.f32 %v36_v16, %v17_v15 }
 0x13e   :  { %v39_v18 = vsel %vm38_vm1, %v37_v17, 0.0 }
 0x13f   :  { %40 = vadd.xlane.f32.xlu1 %v39_v18 }
 0x143   :  { %50 = vadd.xlane.f32.xlu1 %v49_v19 }
 0x1cc   :  { %v41_v20 = vpop.xlane.xlu1 %40 }
 0x1cd   :  { %v42_v21 = vrot.slane %v41_v20, 4 }
 0x1cf   :  { %v43_v22 = vadd.f32 %v42_v21, %v41_v20 }
 0x1d0   :  { %v51_v23 = vpop.xlane.xlu1 %50 }
 0x1d1   :  { %v44_v24 = vrot.slane %v43_v22, 2  ;;  %v52_v25 = vrot.slane %v51_v23, 4 }
 0x1d3   :  { %v53_v26 = vadd.f32 %v52_v25, %v51_v23  ;;  %v45_v27 = vadd.f32 %v44_v24, %v43_v22 }
 0x1d5   :  { %v54_v28 = vrot.slane %v53_v26, 2  ;;  %v46_v29 = vrot.slane %v45_v27, 1 }
 0x1d7   :  { %v55_v30 = vadd.f32 %v54_v28, %v53_v26  ;;  %v47_v31 = vadd.f32 %v46_v29, %v45_v27 }
 0x1d9   :  { %81 = vpush %v47_v31  ;;  %v56_v32 = vrot.slane %v55_v30, 1 }
 0x1db   :  { %v57_v33 = vadd.f32 %v56_v32, %v55_v30 }
 0x1dd   :  { %83 = vpush %v57_v33 }
 0x20a   :  { %s82_s2 = spop %81 }
 0x20b   :  { %v60_v34 = vstv %s82_s2 }
 0x20c   :  { %v61_v36 = vsel %vm59_vm2, %v60_v34, 0.0 }
 0x20e   :  { %s84_s16 = spop %83 }
 0x20f   :  { %v63_v35 = vstv %s84_s16 }
 0x210   :  { %v64_v37 = vsel %vm62_vm3, %v63_v35, 0.0 }
 0x211   :  { %v65_v38 = vadd.f32 %v64_v37, %v61_v36 }
 0x213   :  { %66 = vst [vmem:[#allocation2] sm:$0xff] %v65_v38 }
 0x214   :  { %103 = shalt.err (!%p100_p4)
}
 0x215   :  { %s104_s22 = scalar_lea.hbm %s162_s3, 128 }
 0x216   :  { %p105_p5 = scmp.ne.s32.totalorder %s162_s3, %s104_s22  ;;  %p108_p6 = scmp.lt.u32.totalorder %s104_s22, %s162_s3 }
 0x218   :  { %p110_p7 = pnand %p108_p6, %p105_p5 }
 0x21a   :  { %113 = shalt.err (!%p110_p7)
}
 0x21b   :  { %76 = dma.vmem_to_hbm [thread:$0]  %s74_s18, 128, %s162_s3, [#allocation3]  }
 0x21c   :  { %114 = dma.done.wait [#allocation3], 128  }
 0x21d   :  { %115 = vsyncadd [#allocation3], 4294967168 }
 0x21e   :  { %80 = vsyncpa [#allocation3], 1 }

</bundles_post_ra>
